<compile_context>
chip_gen: v7x
topology: tpu7x:2x2x1
jax: 0.10.0
libtpu: 0.0.40
codegen_flags: <defaults>
</compile_context>

<pallas_src>
import jax
import jax.numpy as jnp
from jax.experimental import pallas as pl
from jax.experimental.pallas import tpu as pltpu

_LANE = 128
_SUBLANE = 8


def _round_up(x, m):
    return ((x + m - 1) // m) * m


def _vmem_budget_bytes():
    """Generation-aware VMEM budget with headroom left for the compiler."""
    phys = None
    try:
        info = pltpu.get_tpu_info()
        phys = getattr(info, "vmem_capacity_bytes", None)
    except Exception:
        phys = None
    if not phys:
        phys = 64 * 1024 * 1024  # assume the smallest per-TC VMEM (v7x)
    # ~5/8 of physical: ~40 MiB on v7x, ~80 MiB on v5e/v6e.
    return int(phys) * 5 // 8


def _plan(B, D_in, D_out, M, H, out_itemsize):
    """Static tiling plan: batch tile, padded dims, VMEM-budget-derived kc."""
    D_in_pad = max(_LANE, _round_up(D_in, _LANE))
    D_out_pad = max(_LANE, _round_up(D_out, _LANE))
    MH = M * H
    mh_128 = _round_up(MH, _LANE)

    # Batch tiling (parallel grid axis; shards across TCs on v7x, fills MXU rows).
    B_pad = _round_up(B, _SUBLANE)
    tb = min(B_pad, 256)
    if B_pad > tb:
        B_pad = _round_up(B_pad, tb)
    nb = B_pad // tb

    # VMEM accounting per grid step (bytes).
    budget = _vmem_budget_bytes()
    fixed = (
        2 * tb * D_in_pad * 2              # bf16 x tile (double-buffered)
        + mh_128 * 4                       # resident f32 b1c
        + 2 * D_out_pad * 4                # summed b2 (f32)
        + 2 * tb * D_out_pad * out_itemsize  # output tile (double-buffered)
        + tb * D_out_pad * 4               # f32 scratch accumulator
    )
    # Per unit of kc: double-buffered bf16 W1c/W2s chunks + f32/bf16 h.
    per_kc = 4 * (D_in_pad + D_out_pad) + 6 * tb
    kc_cap = max(_LANE, (budget - fixed) // per_kc)
    align = 256 if kc_cap >= 256 else _LANE     # 256 fills v6e/v7x MXUs
    kc_cap = max(_LANE, (kc_cap // align) * align)

    if mh_128 <= kc_cap:
        kc = mh_128
        MH_pad = mh_128
    else:
        kc = kc_cap
        MH_pad = _round_up(MH, kc)
    num_k = MH_pad // kc

    return dict(B=B, B_pad=B_pad, tb=tb, nb=nb,
                D_in=D_in, D_in_pad=D_in_pad,
                D_out=D_out, D_out_pad=D_out_pad,
                M=M, MH=MH, MH_pad=MH_pad,
                kc=kc, num_k=num_k, vmem_budget=budget)


def pack_ensemble_params(w1, b1, w2, b2, plan):
    """Fuse + pad member weights into lane-dense bf16 operands.

    Pack ONCE and reuse across calls — this is a full pass over all ensemble
    weights and would otherwise cost as much as the kernel itself per call.
    """
    M, D_in, H = w1.shape
    D_out = w2.shape[-1]
    MH = M * H
    D_in_pad, D_out_pad, MH_pad = plan["D_in_pad"], plan["D_out_pad"], plan["MH_pad"]

    # W1c[d, m*H + h] = w1[m, d, h];  W2s[m*H + h, o] = w2[m, h, o]
    w1c = jnp.transpose(w1, (1, 0, 2)).reshape(D_in, MH).astype(jnp.bfloat16)
    b1c = b1.reshape(1, MH).astype(jnp.float32)
    w2s = w2.reshape(MH, D_out).astype(jnp.bfloat16)
    b2s = jnp.sum(b2.astype(jnp.float32), axis=0, keepdims=True)  # [1, D_out]

    # Zero-padding is exact: padded hidden units give relu(0 + 0) @ 0 = 0 and
    # padded input rows multiply zero x columns.
    w1c = jnp.pad(w1c, ((0, D_in_pad - D_in), (0, MH_pad - MH)))
    b1c = jnp.pad(b1c, ((0, 0), (0, MH_pad - MH)))
    w2s = jnp.pad(w2s, ((0, MH_pad - MH), (0, D_out_pad - D_out)))
    b2s = jnp.pad(b2s, ((0, 0), (0, D_out_pad - D_out)))
    return w1c, b1c, w2s, b2s


def _make_kernel(inv_m, kc):
    def kernel(x_ref, w1_ref, b1_ref, w2_ref, b2_ref, o_ref, acc_ref):
        k = pl.program_id(1)

        @pl.when(k == 0)
        def _():
            acc_ref[...] = jnp.zeros_like(acc_ref)

        # Layer 1 chunk: relu(x @ W1_chunk + b1_chunk) -> [tb, kc] f32
        h = jnp.dot(x_ref[...], w1_ref[...],
                    preferred_element_type=jnp.float32)
        off = pl.multiple_of(k * kc, _LANE)
        h = jnp.maximum(h + b1_ref[:, pl.ds(off, kc)], 0.0).astype(w2_ref.dtype)

        # Layer 2 chunk: accumulate partial member-sum -> [tb, D_out_pad] f32
        acc_ref[...] += jnp.dot(h, w2_ref[...],
                                preferred_element_type=jnp.float32)

        # Finalize: add summed second-layer bias, divide by M, lane-dense store.
        @pl.when(k == pl.num_programs(1) - 1)
        def _():
            o_ref[...] = ((acc_ref[...] + b2_ref[...]) * inv_m).astype(o_ref.dtype)

    return kernel


def deep_ensemble_packed(x, w1c, b1c, w2s, b2s, plan):
    """Run the ensemble kernel on pre-packed (fused/padded) weights."""
    out_dtype = x.dtype
    B, D_in = x.shape
    tb, nb = plan["tb"], plan["nb"]
    kc, num_k = plan["kc"], plan["num_k"]
    B_pad, D_in_pad = plan["B_pad"], plan["D_in_pad"]
    D_out, D_out_pad = plan["D_out"], plan["D_out_pad"]
    MH_pad = plan["MH_pad"]

    xb = jnp.pad(x.astype(jnp.bfloat16),
                 ((0, B_pad - B), (0, D_in_pad - D_in)))

    kernel = _make_kernel(1.0 / plan["M"], kc)

    grid_spec = pltpu.PrefetchScalarGridSpec(
        num_scalar_prefetch=0,
        grid=(nb, num_k),
        in_specs=[
            pl.BlockSpec((tb, D_in_pad), lambda b, k: (b, 0)),      # x tile
            pl.BlockSpec((D_in_pad, kc), lambda b, k: (0, k)),      # W1c chunk
            pl.BlockSpec((1, MH_pad), lambda b, k: (0, 0)),         # b1c (resident)
            pl.BlockSpec((kc, D_out_pad), lambda b, k: (k, 0)),     # W2s chunk
            pl.BlockSpec((1, D_out_pad), lambda b, k: (0, 0)),      # summed b2
        ],
        out_specs=pl.BlockSpec((tb, D_out_pad), lambda b, k: (b, 0)),
        scratch_shapes=[pltpu.VMEM((tb, D_out_pad), jnp.float32)],  # f32 acc
    )

    out_padded = pl.pallas_call(
        kernel,
        out_shape=jax.ShapeDtypeStruct((B_pad, D_out_pad), out_dtype),
        grid_spec=grid_spec,
        compiler_params=pltpu.CompilerParams(
            dimension_semantics=("parallel", "arbitrary"),
            vmem_limit_bytes=plan["vmem_budget"],
        ),
    )(xb, w1c, b1c, w2s, b2s)

    return out_padded[:B, :D_out]


def deep_ensemble(x, w1, b1, w2, b2):
    """x: [B, D_in]; w1: [M, D_in, H]; b1: [M, H]; w2: [M, H, D_out]; b2: [M, D_out].

    Returns mean over the M ensemble members of relu(x @ W1_m + b1_m) @ W2_m + b2_m.
    (Convenience wrapper; for repeated inference call pack_ensemble_params once
    and reuse deep_ensemble_packed.)
    """
    M, D_in, H = w1.shape
    D_out = w2.shape[-1]
    B = x.shape[0]
    plan = _plan(B, D_in, D_out, M, H, jnp.dtype(x.dtype).itemsize)
    packed = pack_ensemble_params(w1, b1, w2, b2, plan)
    return deep_ensemble_packed(x, *packed, plan)


def deep_ensemble_ref(x, w1, b1, w2, b2):
    """Pure-JAX f32 reference: torch.stack([model(x) ...]).mean(0)."""
    def one(w1m, b1m, w2m, b2m):
        h = jnp.maximum(x @ w1m + b1m, 0.0)
        return h @ w2m + b2m
    outs = jax.vmap(one)(w1, b1, w2, b2)   # [M, B, D_out]
    return jnp.mean(outs, axis=0)


if __name__ == "__main__":
    # Small, deterministic configuration.
    M = 4        # number of ensemble members
    B = 8        # batch
    D_in = 32    # input features
    H = 64       # hidden width
    D_out = 32   # output features

    key = jax.random.PRNGKey(0)
    kx, kw1, kb1, kw2, kb2 = jax.random.split(key, 5)

    x = jax.random.normal(kx, (B, D_in), dtype=jnp.float32)
    w1 = jax.random.normal(kw1, (M, D_in, H), dtype=jnp.float32) * 0.1
    b1 = jax.random.normal(kb1, (M, H), dtype=jnp.float32) * 0.1
    w2 = jax.random.normal(kw2, (M, H, D_out), dtype=jnp.float32) * 0.1
    b2 = jax.random.normal(kb2, (M, D_out), dtype=jnp.float32) * 0.1

    # Pack once (hoisted out of the per-call path), then run the kernel.
    plan = _plan(B, D_in, D_out, M, H, jnp.dtype(x.dtype).itemsize)
    packed = jax.tree_util.tree_map(jax.block_until_ready,
                                    pack_ensemble_params(w1, b1, w2, b2, plan))

    out = deep_ensemble_packed(x, *packed, plan)
    out = jax.block_until_ready(out)

    ref = deep_ensemble_ref(x, w1, b1, w2, b2)
    assert out.shape == (B, D_out)
    # bf16 weight/activation path vs f32 reference -> loose tolerance.
    assert jnp.allclose(out, ref, atol=2e-2, rtol=2e-2), "mismatch vs reference"

    print("KERNEL_OK")
</pallas_src>

<mosaic_0001>
module attributes {stable_mosaic.version = 11 : i64} {
  func.func @kernel(%arg0: i32, %arg1: i32, %arg2: memref<8x128xbf16, #tpu.memory_space<vmem>>, %arg3: memref<128x256xbf16, #tpu.memory_space<vmem>>, %arg4: memref<1x256xf32, #tpu.memory_space<vmem>>, %arg5: memref<256x128xbf16, #tpu.memory_space<vmem>>, %arg6: memref<1x128xf32, #tpu.memory_space<vmem>>, %arg7: memref<8x128xf32, #tpu.memory_space<vmem>>, %arg8: memref<8x128xf32, #tpu.memory_space<vmem>>) attributes {dimension_semantics = [#tpu.dimension_semantics<parallel>, #tpu.dimension_semantics<arbitrary>], iteration_bounds = array<i64: 1, 1>, scalar_prefetch = 0 : i64, scratch_operands = 1 : i64, tpu.core_type = #tpu.core_type<tc>, window_params = [{transform_indices = @transform_0, window_bounds = array<i64: 8, 128>}, {transform_indices = @transform_1, window_bounds = array<i64: 128, 256>}, {pipeline_mode = #tpu.pipeline_mode<synchronous>, transform_indices = @transform_2, window_bounds = array<i64: 1, 256>}, {transform_indices = @transform_3, window_bounds = array<i64: 256, 128>}, {pipeline_mode = #tpu.pipeline_mode<synchronous>, transform_indices = @transform_4, window_bounds = array<i64: 1, 128>}, {transform_indices = @transform_5, window_bounds = array<i64: 8, 128>}]} {
    %c0_i32 = arith.constant 0 : i32
    %0 = arith.cmpi eq, %arg1, %c0_i32 : i32
    %1 = arith.extui %0 : i1 to i32
    %c0_i32_0 = arith.constant 0 : i32
    %2 = arith.cmpi ne, %1, %c0_i32_0 : i32
    scf.if %2 {
      %cst_15 = arith.constant 0.000000e+00 : f32
      %23 = vector.broadcast %cst_15 : f32 to vector<8x128xf32>
      %c0_16 = arith.constant 0 : index
      %c0_17 = arith.constant 0 : index
      %24 = vector.load %arg8[%c0_16, %c0_17] : memref<8x128xf32, #tpu.memory_space<vmem>>, vector<8x128xf32>
      tpu.vector_store %arg8[%c0_16, %c0_17], %23 {strides = array<i32>} : memref<8x128xf32, #tpu.memory_space<vmem>>, vector<8x128xf32>,
    } else {
    }
    %c0 = arith.constant 0 : index
    %c0_1 = arith.constant 0 : index
    %3 = vector.load %arg2[%c0, %c0_1] : memref<8x128xbf16, #tpu.memory_space<vmem>>, vector<8x128xbf16>
    %c0_2 = arith.constant 0 : index
    %c0_3 = arith.constant 0 : index
    %4 = vector.load %arg3[%c0_2, %c0_3] : memref<128x256xbf16, #tpu.memory_space<vmem>>, vector<128x256xbf16>
    %cst = arith.constant dense<0.000000e+00> : vector<8x256xf32>
    %5 = tpu.matmul %3, %4, %cst {dimension_numbers = #tpu.dot_dimension_numbers<[1], [0], [0], [1], [0, 0, 1, 1], [], []>} : vector<8x128xbf16>, vector<128x256xbf16>, vector<8x256xf32> -> vector<8x256xf32>
    %c256_i32 = arith.constant 256 : i32
    %6 = arith.muli %arg1, %c256_i32 : i32
    %7 = tpu.assume_multiple %6, 128 : i32
    %c0_4 = arith.constant 0 : index
    %8 = arith.index_cast %7 : i32 to index
    %9 = vector.load %arg4[%c0_4, %8] : memref<1x256xf32, #tpu.memory_space<vmem>>, vector<1x256xf32>
    %10 = vector.broadcast %9 : vector<1x256xf32> to vector<8x256xf32>
    %11 = arith.addf %5, %10 : vector<8x256xf32>
    %cst_5 = arith.constant 0.000000e+00 : f32
    %12 = vector.broadcast %cst_5 : f32 to vector<8x256xf32>
    %13 = arith.maximumf %11, %12 : vector<8x256xf32>
    %14 = arith.truncf %13 : vector<8x256xf32> to vector<8x256xbf16>
    %c0_6 = arith.constant 0 : index
    %c0_7 = arith.constant 0 : index
    %15 = vector.load %arg8[%c0_6, %c0_7] : memref<8x128xf32, #tpu.memory_space<vmem>>, vector<8x128xf32>
    %c0_8 = arith.constant 0 : index
    %c0_9 = arith.constant 0 : index
    %16 = vector.load %arg5[%c0_8, %c0_9] : memref<256x128xbf16, #tpu.memory_space<vmem>>, vector<256x128xbf16>
    %cst_10 = arith.constant dense<0.000000e+00> : vector<8x128xf32>
    %17 = tpu.matmul %14, %16, %cst_10 {dimension_numbers = #tpu.dot_dimension_numbers<[1], [0], [0], [1], [0, 0, 1, 1], [], []>} : vector<8x256xbf16>, vector<256x128xbf16>, vector<8x128xf32> -> vector<8x128xf32>
    %18 = arith.addf %15, %17 : vector<8x128xf32>
    %c0_11 = arith.constant 0 : index
    %c0_12 = arith.constant 0 : index
    %19 = vector.load %arg8[%c0_11, %c0_12] : memref<8x128xf32, #tpu.memory_space<vmem>>, vector<8x128xf32>
    tpu.vector_store %arg8[%c0_11, %c0_12], %18 {strides = array<i32>} : memref<8x128xf32, #tpu.memory_space<vmem>>, vector<8x128xf32>,
    %c0_i32_13 = arith.constant 0 : i32
    %20 = arith.cmpi eq, %arg1, %c0_i32_13 : i32
    %21 = arith.extui %20 : i1 to i32
    %c0_i32_14 = arith.constant 0 : i32
    %22 = arith.cmpi ne, %21, %c0_i32_14 : i32
    scf.if %22 {
      %c0_15 = arith.constant 0 : index
      %c0_16 = arith.constant 0 : index
      %23 = vector.load %arg8[%c0_15, %c0_16] : memref<8x128xf32, #tpu.memory_space<vmem>>, vector<8x128xf32>
      %c0_17 = arith.constant 0 : index
      %c0_18 = arith.constant 0 : index
      %24 = vector.load %arg6[%c0_17, %c0_18] : memref<1x128xf32, #tpu.memory_space<vmem>>, vector<1x128xf32>
      %25 = vector.broadcast %24 : vector<1x128xf32> to vector<8x128xf32>
      %26 = arith.addf %23, %25 : vector<8x128xf32>
      %cst_19 = arith.constant 2.500000e-01 : f32
      %27 = vector.broadcast %cst_19 : f32 to vector<8x128xf32>
      %28 = arith.mulf %26, %27 : vector<8x128xf32>
      %c0_20 = arith.constant 0 : index
      %c0_21 = arith.constant 0 : index
      %29 = vector.load %arg7[%c0_20, %c0_21] : memref<8x128xf32, #tpu.memory_space<vmem>>, vector<8x128xf32>
      tpu.vector_store %arg7[%c0_20, %c0_21], %28 {strides = array<i32>} : memref<8x128xf32, #tpu.memory_space<vmem>>, vector<8x128xf32>,
    } else {
    }
    return
  }
  func.func @transform_0(%arg0: i32, %arg1: i32) -> (i32, i32) {
    %c0_i32 = arith.constant 0 : i32
    %c0_i32_0 = arith.constant 0 : i32
    return %arg0, %c0_i32 : i32, i32
  }
  func.func @transform_1(%arg0: i32, %arg1: i32) -> (i32, i32) {
    %c0_i32 = arith.constant 0 : i32
    %c0_i32_0 = arith.constant 0 : i32
    return %c0_i32, %arg1 : i32, i32
  }
  func.func @transform_2(%arg0: i32, %arg1: i32) -> (i32, i32) {
    %c0_i32 = arith.constant 0 : i32
    %c0_i32_0 = arith.constant 0 : i32
    %c0_i32_1 = arith.constant 0 : i32
    return %c0_i32, %c0_i32_0 : i32, i32
  }
  func.func @transform_3(%arg0: i32, %arg1: i32) -> (i32, i32) {
    %c0_i32 = arith.constant 0 : i32
    %c0_i32_0 = arith.constant 0 : i32
    return %arg1, %c0_i32 : i32, i32
  }
  func.func @transform_4(%arg0: i32, %arg1: i32) -> (i32, i32) {
    %c0_i32 = arith.constant 0 : i32
    %c0_i32_0 = arith.constant 0 : i32
    %c0_i32_1 = arith.constant 0 : i32
    return %c0_i32, %c0_i32_0 : i32, i32
  }
  func.func @transform_5(%arg0: i32, %arg1: i32) -> (i32, i32) {
    %c0_i32 = arith.constant 0 : i32
    %c0_i32_0 = arith.constant 0 : i32
    return %arg0, %c0_i32 : i32, i32
  }
}

</mosaic_0001>

<bundles_post_ra>
// kernel: tpu_custom_call.1
= control target key start
LH: loop header
LB: loop body
LE: loop exit
PB: predicated region body
PF: predicated region fallthrough
CT: control target
= control target key end

     0   :  { %10 = vsyncpa [#allocation4], 0  ;;  %s717_s0 = inlined_call_operand.hbm [shape: bf16[8,128], index: 0, kind: input, shape index: {}]   ;;  %s718_s1 = inlined_call_operand.hbm [shape: bf16[128,256], index: 1, kind: input, shape index: {}]   ;;  %s719_s2 = inlined_call_operand.vmem [shape: f32[1,256], index: 2, kind: input, shape index: {}]   ;;  %s720_s3 = inlined_call_operand.hbm [shape: bf16[256,128], index: 3, kind: input, shape index: {}]   ;;  %s721_s4 = inlined_call_operand.vmem [shape: f32[1,128], index: 4, kind: input, shape index: {}]   ;;  %s722_s5 = inlined_call_operand.hbm [shape: f32[8,128], index: 5, kind: output, shape index: {}]  }
   0x1   :  { %11 = vsyncpa [#allocation7], 0 }
   0x2   :  { %12 = vsyncpa [#allocation5], 0  ;;  %s624_s18 = smov [#allocation6]   ;;  %s530_s22 = scalar_lea.hbm %s718_s1, 2048 }
   0x3   :  { %s28_s19 = sshll.u32 %s624_s18, 4  ;;  %p531_p0 = scmp.ne.s32.totalorder %s718_s1, %s530_s22  ;;  %s29_s19 = int_to_ptr.vmem [resolvable:$true] %s28_s19 }
   0x4   :  { %p534_p1 = scmp.lt.u32.totalorder %s530_s22, %s718_s1 }
   0x6   :  { %p536_p2 = pnand %p534_p1, %p531_p0 }
   0x8   :  { %539 = shalt.err (!%p536_p2)
}
   0x9   :  { %s540_s27 = scalar_lea.vmem %s29_s19, 2048  ;;  %p545_p4 = scmp.lt.s32.totalorder %s29_s19, %s29_s19 }
   0xa   :  { %p541_p3 = scmp.ne.s32.totalorder %s29_s19, %s540_s27  ;;  %p546_p5 = scmp.lt.s32.totalorder %s540_s27, %s540_s27 }
   0xc   :  { %p547_p6 = por %p546_p5, %p545_p4 }
   0xe   :  { %p548_p7 = pnand %p547_p6, %p541_p3 }
  0x10   :  { %551 = shalt.err (!%p548_p7)
}
  0x11   :  { %s625_s28 = smov 128   ;;  %s626_s29 = smov 8  }
  0x12   :  { %34 = dma.hbm_to_vmem [thread:$0]  %s718_s1, 2048, %s29_s19, [#allocation7], %s625_s28, %s625_s28, %s626_s29  }
  0x13   :  { %s627_s7 = smov [#allocation3]   ;;  %s628_s9 = smov [#allocation8]  }
  0x14   :  { %s19_s8 = sshll.u32 %s627_s7, 4  ;;  %s42_s10 = sshll.u32 %s628_s9, 4  ;;  %s20_s8 = int_to_ptr.vmem [resolvable:$true] %s19_s8  ;;  %s43_s10 = int_to_ptr.vmem [resolvable:$true] %s42_s10 }
  0x15   :  { %s552_s13 = scalar_lea.hbm %s717_s0, 64 }
  0x16   :  { %p553_p8 = scmp.ne.s32.totalorder %s717_s0, %s552_s13  ;;  %p556_p9 = scmp.lt.u32.totalorder %s552_s13, %s717_s0 }
  0x18   :  { %p558_p10 = pnand %p556_p9, %p553_p8 }
  0x1a   :  { %561 = shalt.err (!%p558_p10)
}
  0x1b   :  { %s562_s1 = scalar_lea.vmem %s20_s8, 64  ;;  %p567_p12 = scmp.lt.s32.totalorder %s20_s8, %s20_s8 }
  0x1c   :  { %p563_p11 = scmp.ne.s32.totalorder %s20_s8, %s562_s1  ;;  %p568_p13 = scmp.lt.s32.totalorder %s562_s1, %s562_s1 }
  0x1e   :  { %p569_p0 = por %p568_p13, %p567_p12 }
  0x20   :  { %p570_p1 = pnand %p569_p0, %p563_p11 }
  0x22   :  { %573 = shalt.err (!%p570_p1)
}
  0x23   :  { %22 = dma.hbm_to_vmem [thread:$0]  %s717_s0, 64, %s20_s8, [#allocation4]  }
  0x24   :  { %s574_s22 = scalar_lea.hbm %s720_s3, 2048 }
  0x25   :  { %p575_p2 = scmp.ne.s32.totalorder %s720_s3, %s574_s22  ;;  %p578_p3 = scmp.lt.u32.totalorder %s574_s22, %s720_s3 }
  0x27   :  { %p580_p4 = pnand %p578_p3, %p575_p2 }
  0x29   :  { %583 = shalt.err (!%p580_p4)
}
  0x2a   :  { %s584_s27 = scalar_lea.vmem %s43_s10, 2048  ;;  %p589_p6 = scmp.lt.s32.totalorder %s43_s10, %s43_s10 }
  0x2b   :  { %p585_p5 = scmp.ne.s32.totalorder %s43_s10, %s584_s27  ;;  %p590_p7 = scmp.lt.s32.totalorder %s584_s27, %s584_s27 }
  0x2d   :  { %p591_p8 = por %p590_p7, %p589_p6 }
  0x2f   :  { %p592_p9 = pnand %p591_p8, %p585_p5 }
  0x31   :  { %595 = shalt.err (!%p592_p9)
}
  0x32   :  { %s629_s0 = smov 64   ;;  %s630_s28 = smov 4  }
  0x33   :  { %48 = dma.hbm_to_vmem [thread:$0]  %s720_s3, 2048, %s43_s10, [#allocation7], %s629_s0, %s629_s0, %s630_s28  }
  0x34   :  { %618 = dma.done.wait [#allocation4], 64  }
  0x35   :  { %619 = vsyncadd [#allocation4], 4294967232 }
  0x36   :  { %620 = dma.done.wait [#allocation7], 4096  }
  0x37   :  { %621 = vsyncadd [#allocation7], 4294963200  ;;  %v631_v0 = vmov 0   ;;  %v490_v1 = vld [vmem:[#allocation6 + $0x4] ss:$8 sps:$4 sm:$0xff]   ;;  %v518_v15 = vld [vmem:[#allocation8 + $0x50] sm:$0xff]   ;;  %v89_v34 = vlaneseq }
  0x38   :  { %211 = vmatprep.mubr.bf16.mxu0 %v631_v0  ;;  %v492_v2 = vld [vmem:[#allocation6] ss:$8 sps:$4 sm:$0xff]   ;;  %179 = vmatprep.subr.bf16.mxu0 %v490_v1  ;;  %v493_v3 = vld [vmem:[#allocation6 + $0x14] ss:$8 sps:$4 sm:$0xff]   ;;  %v495_v4 = vld [vmem:[#allocation6 + $0x10] ss:$8 sps:$4 sm:$0xff]  }
  0x39   :  { %180 = vmatpush1.bf16.msra.mxu0 %v492_v2  ;;  %v496_v5 = vld [vmem:[#allocation6 + $0x24] ss:$8 sps:$4 sm:$0xff]   ;;  %v498_v6 = vld [vmem:[#allocation6 + $0x20] ss:$8 sps:$4 sm:$0xff]   ;;  %v499_v7 = vld [vmem:[#allocation6 + $0x34] ss:$8 sps:$4 sm:$0xff]  }
  0x3a   :  { %181 = vmatprep.subr.bf16.mxu0 %v493_v3  ;;  %v501_v8 = vld [vmem:[#allocation6 + $0x30] ss:$8 sps:$4 sm:$0xff]   ;;  %v502_v9 = vld [vmem:[#allocation6 + $0x44] ss:$8 sps:$4 sm:$0xff]   ;;  %v504_v12 = vld [vmem:[#allocation6 + $0x40] ss:$8 sps:$4 sm:$0xff]  }
  0x3b   :  { %v514_v10 = vld [vmem:[#allocation8 + $0x40] sm:$0xff]   ;;  %v516_v13 = vld [vmem:[#allocation8 + $0x48] sm:$0xff]   ;;  %v505_v16 = vld [vmem:[#allocation6 + $0x54] ss:$8 sps:$4 sm:$0xff]   ;;  %v90_v35 = vshrl.u32 %v89_v34, 7 }
  0x3c   :  { %v515_v11 = vld [vmem:[#allocation8] sm:$0xff]   ;;  %459 = vmatprep.subr.bf16.mxu1 %v514_v10  ;;  %v517_v14 = vld [vmem:[#allocation8 + $0x8] sm:$0xff]   ;;  %v507_v17 = vld [vmem:[#allocation6 + $0x50] ss:$8 sps:$4 sm:$0xff]  }
  0x3d   :  { %182 = vmatpush1.bf16.msra.mxu0 %v495_v4  ;;  %460 = vmatpush3.bf16.msra.mxu1 %v515_v11  ;;  %v519_v18 = vld [vmem:[#allocation8 + $0x10] sm:$0xff]   ;;  %v520_v19 = vld [vmem:[#allocation8 + $0x58] sm:$0xff]   ;;  %v508_v20 = vld [vmem:[#allocation6 + $0x64] ss:$8 sps:$4 sm:$0xff]   ;;  %v91_v36 = vsub.s32 0, %v90_v35  ;;  %v95_v38 = vsub.s32 1, %v90_v35 }
  0x3e   :  { %183 = vmatprep.subr.bf16.mxu0 %v496_v5  ;;  %461 = vmatprep.subr.bf16.mxu1 %v516_v13  ;;  %v510_v21 = vld [vmem:[#allocation6 + $0x60] ss:$8 sps:$4 sm:$0xff]   ;;  %v511_v22 = vld [vmem:[#allocation6 + $0x74] ss:$8 sps:$4 sm:$0xff]   ;;  %v513_v26 = vld [vmem:[#allocation6 + $0x70] ss:$8 sps:$4 sm:$0xff]  }
  0x3f   :  { %v521_v23 = vld [vmem:[#allocation8 + $0x18] sm:$0xff]   ;;  %v522_v24 = vld [vmem:[#allocation8 + $0x60] sm:$0xff]   ;;  %v524_v27 = vld [vmem:[#allocation8 + $0x68] sm:$0xff]  }
  0x40   :  { %v523_v25 = vld [vmem:[#allocation8 + $0x20] sm:$0xff]   ;;  %v525_v28 = vld [vmem:[#allocation8 + $0x28] sm:$0xff]   ;;  %v66_v29 = vld [vmem:[#allocation3] sm:$0xf] }
  0x41   :  { %184 = vmatpush1.bf16.msra.mxu0 %v498_v6  ;;  %462 = vmatpush3.bf16.msra.mxu1 %v517_v14  ;;  %v526_v30 = vld [vmem:[#allocation8 + $0x70] sm:$0xff]   ;;  %v528_v32 = vld [vmem:[#allocation8 + $0x78] sm:$0xff]  }
  0x42   :  { %185 = vmatprep.subr.bf16.mxu0 %v499_v7  ;;  %463 = vmatprep.subr.bf16.mxu1 %v518_v15  ;;  %v527_v31 = vld [vmem:[#allocation8 + $0x30] sm:$0xff]   ;;  %v529_v33 = vld [vmem:[#allocation8 + $0x38] sm:$0xff]  }
  0x43   :  { %v87_v37 = vld [vmem:[%s719_s2] sm:$0x3]  ;;  %s632_s2 = smov [#allocation9]  }
  0x44   :  { %v92_v39 = vrot.slane %v87_v37, %v91_v36  ;;  %v96_v40 = vrot.slane %v87_v37, %v95_v38  ;;  %v458_v53 = vld [vmem:[%s721_s4] ss:$0 sm:$0xff]  ;;  %s415_s9 = sshll.u32 %s632_s2, 4  ;;  %s416_s9 = int_to_ptr.vmem [resolvable:$true] %s415_s9 }
  0x45   :  { %186 = vmatpush1.bf16.msra.mxu0 %v501_v8  ;;  %464 = vmatpush3.bf16.msra.mxu1 %v519_v18  ;;  %s596_s10 = scalar_lea.vmem %s416_s9, 128  ;;  %p601_p11 = scmp.lt.s32.totalorder %s416_s9, %s416_s9 }
  0x46   :  { %187 = vmatprep.subr.bf16.mxu0 %v502_v9  ;;  %465 = vmatprep.subr.bf16.mxu1 %v520_v19  ;;  %p597_p10 = scmp.ne.s32.totalorder %s416_s9, %s596_s10  ;;  %p602_p12 = scmp.lt.s32.totalorder %s596_s10, %s596_s10 }
  0x48   :  { %p603_p13 = por %p602_p12, %p601_p11 }
  0x49   :  { %188 = vmatpush1.bf16.msra.mxu0 %v504_v12  ;;  %466 = vmatpush3.bf16.msra.mxu1 %v521_v23 }
  0x4a   :  { %189 = vmatprep.subr.bf16.mxu0 %v505_v16  ;;  %467 = vmatprep.subr.bf16.mxu1 %v522_v24  ;;  %p604_p0 = pnand %p603_p13, %p597_p10 }
  0x4d   :  { %190 = vmatpush1.bf16.msra.mxu0 %v507_v17  ;;  %468 = vmatpush3.bf16.msra.mxu1 %v523_v25 }
  0x4e   :  { %191 = vmatprep.subr.bf16.mxu0 %v508_v20  ;;  %469 = vmatprep.subr.bf16.mxu1 %v524_v27 }
  0x51   :  { %192 = vmatpush1.bf16.msra.mxu0 %v510_v21  ;;  %470 = vmatpush3.bf16.msra.mxu1 %v525_v28 }
  0x52   :  { %193 = vmatprep.subr.bf16.mxu0 %v511_v22  ;;  %471 = vmatprep.subr.bf16.mxu1 %v526_v30 }
  0x55   :  { %194 = vmatpush1.bf16.msra.mxu0 %v513_v26  ;;  %472 = vmatpush3.bf16.msra.mxu1 %v527_v31 }
  0x56   :  { %473 = vmatprep.subr.bf16.mxu1 %v528_v32 }
  0x58   :  { %212 = vmatmul.mubr.bf16.vlgmr.msra.gmra.mrb[0].mxu0 %v66_v29 }
  0x59   :  { %474 = vmatpush3.bf16.msra.mxu1 %v529_v33 }
 0x12b   :  { %v213_v41 = vpop.f32.mrb[0].mxu0 }
 0x12c   :  { %v214_v42 = vadd.f32 %v213_v41, %v92_v39  ;;  %v215_v43 = vpop.f32.mrb[1].mxu0 }
 0x12d   :  { %v216_v44 = vadd.f32 %v215_v43, %v96_v40  ;;  %v217_v45 = vpop.f32.mrb[2].mxu0 }
 0x12e   :  { %v220_v46 = vmax.f32 %v214_v42, 0.0  ;;  %v218_v47 = vpop.f32.mrb[3].mxu0 }
 0x12f   :  { %v221_v48 = vmax.f32 %v216_v44, 0.0 }
 0x130   :  { %v222_v50 = vpack.c.bf16 %v220_v46, %v220_v46 }
 0x131   :  { %v223_v49 = vpack.c.bf16 %v221_v48, %v221_v48 }
 0x133   :  { %385 = vmatprep.mubr.bf16.mxu1 %v223_v49 }
 0x134   :  { %386 = vmatmul.mubr.bf16.vlgmr.msra.gmra.mrb[0].mxu1 %v222_v50 }
 0x207   :  { %v475_v51 = vpop.f32.mrb[0].mxu1 }
 0x208   :  { %v476_v52 = vpop.f32.mrb[1].mxu1 }
 0x209   :  { %v477_v54 = vadd.f32 %v476_v52, %v475_v51  ;;  %v478_v55 = vpop.f32.mrb[2].mxu1 }
 0x20a   :  { %v479_v56 = vpop.f32.mrb[3].mxu1 }
 0x20b   :  { %v406_v57 = vadd.f32 %v477_v54, %v458_v53 }
 0x20d   :  { %v407_v58 = vmul.f32 0.25, %v406_v57 }
 0x20f   :  { %408 = vst [vmem:[#allocation9] sm:$0xff] %v407_v58 }
 0x210   :  { %607 = shalt.err (!%p604_p0)
}
 0x211   :  { %s608_s4 = scalar_lea.hbm %s722_s5, 128 }
 0x212   :  { %p609_p1 = scmp.ne.s32.totalorder %s722_s5, %s608_s4  ;;  %p612_p2 = scmp.lt.u32.totalorder %s608_s4, %s722_s5 }
 0x214   :  { %p614_p3 = pnand %p612_p2, %p609_p1 }
 0x216   :  { %617 = shalt.err (!%p614_p3)
}
 0x217   :  { %418 = dma.vmem_to_hbm [thread:$0]  %s416_s9, 128, %s722_s5, [#allocation5]  }
 0x218   :  { %622 = dma.done.wait [#allocation5], 128  }
 0x219   :  { %623 = vsyncadd [#allocation5], 4294967168 }
 0x21a   :  { %422 = vsyncpa [#allocation4], 1 }
 0x21b   :  { %423 = vsyncpa [#allocation7], 1 }
 0x21c   :  { %424 = vsyncpa [#allocation5], 1 }

</bundles_post_ra>
